<compile_context>
chip_gen: v5e
topology: v5e:2x2
jax: 0.10.0
libtpu: 0.0.40
codegen_flags: <defaults>
</compile_context>

<pallas_src>
import functools

import jax
import jax.numpy as jnp
from jax.experimental import pallas as pl
from jax.experimental.pallas import tpu as pltpu


# ----------------------------------------------------------------------------
# Helpers
# ----------------------------------------------------------------------------
def _round_up(x, m):
    return ((x + m - 1) // m) * m


def _vmem_capacity_bytes():
    """Generation-aware VMEM capacity (v5e/v6e: 128 MiB, v7x: 64 MiB)."""
    try:
        info = pltpu.get_tpu_info()
        cap = int(getattr(info, "vmem_capacity_bytes", 0) or 0)
        if cap > 0:
            return cap
    except Exception:
        pass
    return 64 * 1024 * 1024      # conservative fallback (v7x-sized part)


def build_normalized_adjacency(edge_index, num_nodes):
    """Dense A_hat = D^{-1/2} (A + I) D^{-1/2} (f32) from an edge_index [2, E]."""
    src = edge_index[0]
    dst = edge_index[1]
    adj = jnp.zeros((num_nodes, num_nodes), jnp.float32)
    adj = adj.at[dst, src].add(1.0)                    # message src -> dst
    adj = adj + jnp.eye(num_nodes, dtype=jnp.float32)  # self loops
    deg = jnp.sum(adj, axis=1)
    dinv = jnp.where(deg > 0, jax.lax.rsqrt(jnp.maximum(deg, 1e-12)), 0.0)
    return dinv[:, None] * adj * dinv[None, :]


def _build_a_pad(edge_index, n, n_rows, n_cols, dtype=jnp.bfloat16):
    """Normalized adjacency cast to `dtype` and zero-padded to (n_rows, n_cols).

    The dinv scaling + bf16 cast fuse into a single elementwise pass under XLA
    and the pad is a single op, so the wrapper touches the O(N^2) operand a
    minimal number of times before the kernel streams it.
    """
    a = build_normalized_adjacency(edge_index, n).astype(dtype)
    return jnp.pad(a, ((0, n_rows - n), (0, n_cols - n)))


def _pick_row_tile(n, n_k, hp, dp, budget_bytes):
    """Row tile for streaming A: a multiple of 256 (keeps the 2x256^2 MXU fed on
    v6e/v7x, well above bf16 (16,128) packing), never below 256, and sized so
    A's double buffer + the single-buffered resident z + the output double
    buffers fit in `budget_bytes`."""
    tm = min(2048, _round_up(max(n, 1), 256))

    def need(t):
        return (2 * t * n_k * 2      # A row tiles, double buffered, bf16
                + n_k * hp * 2       # resident z (single buffer)
                + 2 * t * hp * 2     # bf16 z2 output tiles (pass 1)
                + 2 * t * dp * 4)    # f32 output tiles (pass 2)

    while tm > 256 and need(tm) > budget_bytes:
        tm -= 256
    return max(256, tm)


def _resident_spec(block_shape):
    """Grid-invariant operand: constant block index, single VMEM buffer."""
    return pl.BlockSpec(block_shape, lambda i: (0,) * len(block_shape),
                        pipeline_mode=pl.Buffered(1))


def _sigmoid(x):
    # exp (EUP) + approx reciprocal (EUP): keeps the epilogue off the VALU.
    return pl.reciprocal(1.0 + jnp.exp(-x), approx=True)


# ----------------------------------------------------------------------------
# Pallas kernels
# ----------------------------------------------------------------------------
def _gcn_fused_kernel(a_ref, z1_ref, b1_ref, w2_ref, b2_ref, wo_ref, bo_ref,
                      o_ref, *, scale, shift):
    """Whole forward in one kernel; A_hat is read from HBM exactly once.

    out = rescale(sigmoid(relu(A @ (relu(A @ z1 + b1) @ W2) + b2) @ Wo + bo))
    """
    h1 = jnp.maximum(
        jnp.dot(a_ref[...], z1_ref[...], preferred_element_type=jnp.float32)
        + b1_ref[...], 0.0)
    z2 = jnp.dot(h1.astype(jnp.bfloat16), w2_ref[...],
                 preferred_element_type=jnp.float32).astype(jnp.bfloat16)
    # A's padded columns are zero, so the (nonzero) padded rows of z2 cannot
    # contaminate real rows of the second aggregation.
    h2 = jnp.maximum(
        jnp.dot(a_ref[...], z2, preferred_element_type=jnp.float32)
        + b2_ref[...], 0.0)
    logits = jnp.dot(h2.astype(jnp.bfloat16), wo_ref[...],
                     preferred_element_type=jnp.float32) + bo_ref[...]
    out = _sigmoid(logits)
    if scale is not None:                      # static python branch
        out = out * scale + shift
    o_ref[...] = out.astype(o_ref.dtype)


def _gcn_layer1_kernel(a_ref, z1_ref, b1_ref, w2_ref, z2_ref):
    """z2_tile = relu(A_tile @ z1 + b1) @ W2  (bf16 out; W2 fused in-kernel so
    no intermediate h1 round-trip through HBM)."""
    h1 = jnp.maximum(
        jnp.dot(a_ref[...], z1_ref[...], preferred_element_type=jnp.float32)
        + b1_ref[...], 0.0)
    z2_ref[...] = jnp.dot(h1.astype(jnp.bfloat16), w2_ref[...],
                          preferred_element_type=jnp.float32).astype(z2_ref.dtype)


def _gcn_layer2_kernel(a_ref, z2_ref, b2_ref, wo_ref, bo_ref, o_ref, *,
                       scale, shift):
    """out_tile = rescale(sigmoid(relu(A_tile @ z2 + b2) @ Wo + bo))."""
    h2 = jnp.maximum(
        jnp.dot(a_ref[...], z2_ref[...], preferred_element_type=jnp.float32)
        + b2_ref[...], 0.0)
    logits = jnp.dot(h2.astype(jnp.bfloat16), wo_ref[...],
                     preferred_element_type=jnp.float32) + bo_ref[...]
    out = _sigmoid(logits)
    if scale is not None:
        out = out * scale + shift
    o_ref[...] = out.astype(o_ref.dtype)


# ----------------------------------------------------------------------------
# JAX wrapper
# ----------------------------------------------------------------------------
def gcn_imputer_forward(x, edge_index, params, min_max=None, *,
                        force_streaming=False):
    """Full GCN_IMPUTER forward pass (eval mode); the A-matmuls run in Pallas."""
    n, d = x.shape
    h = params["w1"].shape[1]
    hp = _round_up(max(h, 1), 128)             # lane-dense hidden dim
    dp = _round_up(max(d, 1), 128)             # lane-dense output dim

    cap = _vmem_capacity_bytes()
    vmem_limit = int(cap * 0.75)               # leave headroom for scratch

    if min_max is not None:                    # min_max is a python tuple here
        scale = float(min_max[1]) - float(min_max[0])
        shift = float(min_max[0])
    else:
        scale, shift = None, None

    # Tiny dense matmul x @ W1 in f32 JAX glue (O(n*d*h), negligible).
    z1 = x.astype(jnp.float32) @ params["w1"].astype(jnp.float32)     # [n, h]

    def pad2(a, r, c):
        a = a.astype(jnp.float32)
        return jnp.pad(a, ((0, r - a.shape[0]), (0, c - a.shape[1])))

    b1p = pad2(params["b1"].reshape(1, -1), 1, hp)
    b2p = pad2(params["b2"].reshape(1, -1), 1, hp)
    bop = pad2(params["bo"].reshape(1, -1), 1, dp)
    w2p = pad2(params["w2"], hp, hp).astype(jnp.bfloat16)
    wop = pad2(params["wo"], hp, dp).astype(jnp.bfloat16)

    # -------- fused single-pass path: A resident in VMEM, read once ---------
    np2 = _round_up(n, 128)
    fused_bytes = (2 * np2 * np2 * 2            # A (allow a 2nd buffer)
                   + 2 * np2 * hp * 2           # z1
                   + 2 * np2 * dp * 4           # output
                   + 3 * np2 * hp * 4           # h1 / z2 / h2 intermediates
                   + 2 * hp * (hp + dp) * 2)    # W2, Wo
    use_fused = (not force_streaming) and fused_bytes <= int(cap * 0.55)

    if use_fused:
        a_pad = _build_a_pad(edge_index, n, np2, np2)
        z1p = pad2(z1, np2, hp).astype(jnp.bfloat16)
        kern = functools.partial(_gcn_fused_kernel, scale=scale, shift=shift)
        out_pad = pl.pallas_call(
            kern,
            out_shape=jax.ShapeDtypeStruct((np2, dp), jnp.float32),
            grid=(1,),
            in_specs=[
                pl.BlockSpec((np2, np2), lambda i: (0, 0)),   # A resident
                pl.BlockSpec((np2, hp), lambda i: (0, 0)),    # z1
                pl.BlockSpec((1, hp), lambda i: (0, 0)),      # b1
                pl.BlockSpec((hp, hp), lambda i: (0, 0)),     # W2
                pl.BlockSpec((1, hp), lambda i: (0, 0)),      # b2
                pl.BlockSpec((hp, dp), lambda i: (0, 0)),     # Wo
                pl.BlockSpec((1, dp), lambda i: (0, 0)),      # bo
            ],
            out_specs=pl.BlockSpec((np2, dp), lambda i: (0, 0)),
            compiler_params=pltpu.CompilerParams(
                dimension_semantics=("arbitrary",),
                vmem_limit_bytes=vmem_limit),
        )(a_pad, z1p, b1p, w2p, b2p, wop, bop)
        return out_pad[:n, :d]

    # -------- streaming two-pass path (A row tiles, double buffered) --------
    n_k = _round_up(n, 128)                    # K/column padding (lane-dense)
    tm = _pick_row_tile(n, n_k, hp, dp, budget_bytes=int(cap * 0.60))
    n_r = _round_up(n, tm)                     # row padding, decoupled from K
    grid = (n_r // tm,)

    a_pad = _build_a_pad(edge_index, n, n_r, n_k)
    z1p = pad2(z1, n_k, hp).astype(jnp.bfloat16)

    compiler_params = pltpu.CompilerParams(
        # Row tiles are independent -> megacore sharding on multi-TC parts.
        dimension_semantics=("parallel",),
        vmem_limit_bytes=vmem_limit)

    # Pass 1: z2 = relu(A @ z1 + b1) @ W2, emitted in bf16.
    cost1 = pl.CostEstimate(
        flops=2 * n_r * n_k * hp + 2 * n_r * hp * hp,
        transcendentals=0,
        bytes_accessed=n_r * n_k * 2 + n_k * hp * 2 + hp * hp * 2 + n_r * hp * 2)

    z2_full = pl.pallas_call(
        _gcn_layer1_kernel,
        out_shape=jax.ShapeDtypeStruct((n_r, hp), jnp.bfloat16),
        grid=grid,
        in_specs=[
            pl.BlockSpec((tm, n_k), lambda i: (i, 0)),    # stream A row tiles
            _resident_spec((n_k, hp)),                    # z1, single buffer
            _resident_spec((1, hp)),                      # b1
            _resident_spec((hp, hp)),                     # W2
        ],
        out_specs=pl.BlockSpec((tm, hp), lambda i: (i, 0)),
        compiler_params=compiler_params,
        cost_estimate=cost1,
    )(a_pad, z1p, b1p, w2p)

    # Only the first n_k rows feed the second aggregation.  Rows [n, n_k) are
    # nonzero (relu(b1) @ W2) but multiply A's zero padded columns, so they do
    # not contaminate real rows.
    z2p = z2_full[:n_k]

    # Pass 2: out = rescale(sigmoid(relu(A @ z2 + b2) @ Wo + bo)).
    kern2 = functools.partial(_gcn_layer2_kernel, scale=scale, shift=shift)
    cost2 = pl.CostEstimate(
        flops=2 * n_r * n_k * hp + 2 * n_r * hp * dp,
        transcendentals=n_r * dp,
        bytes_accessed=n_r * n_k * 2 + n_k * hp * 2 + hp * dp * 2 + n_r * dp * 4)

    out_pad = pl.pallas_call(
        kern2,
        out_shape=jax.ShapeDtypeStruct((n_r, dp), jnp.float32),
        grid=grid,
        in_specs=[
            pl.BlockSpec((tm, n_k), lambda i: (i, 0)),    # stream A row tiles
            _resident_spec((n_k, hp)),                    # z2, single buffer
            _resident_spec((1, hp)),                      # b2
            _resident_spec((hp, dp)),                     # Wo
            _resident_spec((1, dp)),                      # bo
        ],
        out_specs=pl.BlockSpec((tm, dp), lambda i: (i, 0)),
        compiler_params=compiler_params,
        cost_estimate=cost2,
    )(a_pad, z2p, b2p, wop, bop)

    return out_pad[:n, :d]


# ----------------------------------------------------------------------------
# Deterministic parameter init (shapes from GCN_IMPUTER.__init__)
# ----------------------------------------------------------------------------
def init_params(d, key):
    h = int(d ** 0.5)
    k1, k2, k3 = jax.random.split(key, 3)

    def glorot(k, shape):
        lim = (6.0 / (shape[0] + shape[1])) ** 0.5
        return jax.random.uniform(k, shape, jnp.float32, -lim, lim)

    return {
        # GCNConv1: d -> h
        "w1": glorot(k1, (d, h)),
        "b1": jnp.zeros((1, h), jnp.float32),
        # GCNConv2: h -> h
        "w2": glorot(k2, (h, h)),
        "b2": jnp.zeros((1, h), jnp.float32),
        # Linear out: h -> d
        "wo": glorot(k3, (h, d)),
        "bo": jnp.zeros((1, d), jnp.float32),
    }


# ----------------------------------------------------------------------------
# Pure-JAX reference (full f32) for a sanity check
# ----------------------------------------------------------------------------
def reference_forward(x, edge_index, params, min_max=None):
    a_hat = build_normalized_adjacency(edge_index, x.shape[0])
    h1 = jax.nn.relu(a_hat @ (x @ params["w1"]) + params["b1"])
    h2 = jax.nn.relu(a_hat @ (h1 @ params["w2"]) + params["b2"])
    out = jax.nn.sigmoid(h2 @ params["wo"] + params["bo"])
    if min_max is not None:
        out = out * (min_max[1] - min_max[0]) + min_max[0]
    return out


if __name__ == "__main__":
    key = jax.random.PRNGKey(0)
    k_x, k_p = jax.random.split(key)

    N = 16          # number of graph nodes
    D = 16          # feature dimension d -> hidden = int(sqrt(16)) = 4

    x = jax.random.normal(k_x, (N, D), jnp.float32)

    # Small deterministic undirected ring graph: edges i <-> (i+1) mod N.
    src = jnp.arange(N, dtype=jnp.int32)
    dst = (src + 1) % N
    edge_index = jnp.stack(
        [jnp.concatenate([src, dst]), jnp.concatenate([dst, src])], axis=0
    )  # [2, 2N]

    params = init_params(D, k_p)

    # --- fused single-pass path, no min/max rescale ---------------------------
    ref = reference_forward(x, edge_index, params, min_max=None)
    out = jax.block_until_ready(gcn_imputer_forward(x, edge_index, params))
    assert out.shape == (N, D)
    # A_hat / intermediates are bf16 in the kernel; loosen tolerance accordingly.
    assert jnp.allclose(out, ref, atol=1.5e-2, rtol=1.5e-2), "mismatch (fused)"

    # --- fused path with min/max rescale --------------------------------------
    mm = (-1.0, 3.0)
    ref2 = reference_forward(x, edge_index, params, min_max=mm)
    out2 = jax.block_until_ready(
        gcn_imputer_forward(x, edge_index, params, min_max=mm))
    assert jnp.allclose(out2, ref2, atol=5e-2, rtol=2e-2), "mismatch (fused+mm)"

    # --- streaming two-pass path (row-tiled A, fused W2 epilogue) -------------
    out3 = jax.block_until_ready(
        gcn_imputer_forward(x, edge_index, params, min_max=mm,
                            force_streaming=True))
    assert jnp.allclose(out3, ref2, atol=5e-2, rtol=2e-2), "mismatch (streaming)"

    print("KERNEL_OK")
</pallas_src>

<mosaic_0001>
module attributes {stable_mosaic.version = 11 : i64} {
  func.func @_gcn_fused_kernel(%arg0: i32, %arg1: memref<128x128xbf16, #tpu.memory_space<vmem>>, %arg2: memref<128x128xbf16, #tpu.memory_space<vmem>>, %arg3: memref<1x128xf32, #tpu.memory_space<vmem>>, %arg4: memref<128x128xbf16, #tpu.memory_space<vmem>>, %arg5: memref<1x128xf32, #tpu.memory_space<vmem>>, %arg6: memref<128x128xbf16, #tpu.memory_space<vmem>>, %arg7: memref<1x128xf32, #tpu.memory_space<vmem>>, %arg8: memref<128x128xf32, #tpu.memory_space<vmem>>) attributes {dimension_semantics = [#tpu.dimension_semantics<arbitrary>], iteration_bounds = array<i64: 1>, scalar_prefetch = 0 : i64, scratch_operands = 0 : i64, tpu.core_type = #tpu.core_type<tc>, window_params = [{pipeline_mode = #tpu.pipeline_mode<synchronous>, transform_indices = @transform_0, window_bounds = array<i64: 128, 128>}, {pipeline_mode = #tpu.pipeline_mode<synchronous>, transform_indices = @transform_1, window_bounds = array<i64: 128, 128>}, {pipeline_mode = #tpu.pipeline_mode<synchronous>, transform_indices = @transform_2, window_bounds = array<i64: 1, 128>}, {pipeline_mode = #tpu.pipeline_mode<synchronous>, transform_indices = @transform_3, window_bounds = array<i64: 128, 128>}, {pipeline_mode = #tpu.pipeline_mode<synchronous>, transform_indices = @transform_4, window_bounds = array<i64: 1, 128>}, {pipeline_mode = #tpu.pipeline_mode<synchronous>, transform_indices = @transform_5, window_bounds = array<i64: 128, 128>}, {pipeline_mode = #tpu.pipeline_mode<synchronous>, transform_indices = @transform_6, window_bounds = array<i64: 1, 128>}, {pipeline_mode = #tpu.pipeline_mode<synchronous>, transform_indices = @transform_7, window_bounds = array<i64: 128, 128>}]} {
    %c0 = arith.constant 0 : index
    %c0_0 = arith.constant 0 : index
    %0 = vector.load %arg1[%c0, %c0_0] : memref<128x128xbf16, #tpu.memory_space<vmem>>, vector<128x128xbf16>
    %c0_1 = arith.constant 0 : index
    %c0_2 = arith.constant 0 : index
    %1 = vector.load %arg2[%c0_1, %c0_2] : memref<128x128xbf16, #tpu.memory_space<vmem>>, vector<128x128xbf16>
    %cst = arith.constant dense<0.000000e+00> : vector<128x128xf32>
    %2 = tpu.matmul %0, %1, %cst {dimension_numbers = #tpu.dot_dimension_numbers<[1], [0], [0], [1], [0, 0, 1, 1], [], []>} : vector<128x128xbf16>, vector<128x128xbf16>, vector<128x128xf32> -> vector<128x128xf32>
    %c0_3 = arith.constant 0 : index
    %c0_4 = arith.constant 0 : index
    %3 = vector.load %arg3[%c0_3, %c0_4] : memref<1x128xf32, #tpu.memory_space<vmem>>, vector<1x128xf32>
    %4 = vector.broadcast %3 : vector<1x128xf32> to vector<128x128xf32>
    %5 = arith.addf %2, %4 : vector<128x128xf32>
    %cst_5 = arith.constant 0.000000e+00 : f32
    %6 = vector.broadcast %cst_5 : f32 to vector<128x128xf32>
    %7 = arith.maximumf %5, %6 : vector<128x128xf32>
    %8 = arith.truncf %7 : vector<128x128xf32> to vector<128x128xbf16>
    %c0_6 = arith.constant 0 : index
    %c0_7 = arith.constant 0 : index
    %9 = vector.load %arg4[%c0_6, %c0_7] : memref<128x128xbf16, #tpu.memory_space<vmem>>, vector<128x128xbf16>
    %cst_8 = arith.constant dense<0.000000e+00> : vector<128x128xf32>
    %10 = tpu.matmul %8, %9, %cst_8 {dimension_numbers = #tpu.dot_dimension_numbers<[1], [0], [0], [1], [0, 0, 1, 1], [], []>} : vector<128x128xbf16>, vector<128x128xbf16>, vector<128x128xf32> -> vector<128x128xf32>
    %11 = arith.truncf %10 : vector<128x128xf32> to vector<128x128xbf16>
    %c0_9 = arith.constant 0 : index
    %c0_10 = arith.constant 0 : index
    %12 = vector.load %arg1[%c0_9, %c0_10] : memref<128x128xbf16, #tpu.memory_space<vmem>>, vector<128x128xbf16>
    %cst_11 = arith.constant dense<0.000000e+00> : vector<128x128xf32>
    %13 = tpu.matmul %12, %11, %cst_11 {dimension_numbers = #tpu.dot_dimension_numbers<[1], [0], [0], [1], [0, 0, 1, 1], [], []>} : vector<128x128xbf16>, vector<128x128xbf16>, vector<128x128xf32> -> vector<128x128xf32>
    %c0_12 = arith.constant 0 : index
    %c0_13 = arith.constant 0 : index
    %14 = vector.load %arg5[%c0_12, %c0_13] : memref<1x128xf32, #tpu.memory_space<vmem>>, vector<1x128xf32>
    %15 = vector.broadcast %14 : vector<1x128xf32> to vector<128x128xf32>
    %16 = arith.addf %13, %15 : vector<128x128xf32>
    %cst_14 = arith.constant 0.000000e+00 : f32
    %17 = vector.broadcast %cst_14 : f32 to vector<128x128xf32>
    %18 = arith.maximumf %16, %17 : vector<128x128xf32>
    %19 = arith.truncf %18 : vector<128x128xf32> to vector<128x128xbf16>
    %c0_15 = arith.constant 0 : index
    %c0_16 = arith.constant 0 : index
    %20 = vector.load %arg6[%c0_15, %c0_16] : memref<128x128xbf16, #tpu.memory_space<vmem>>, vector<128x128xbf16>
    %cst_17 = arith.constant dense<0.000000e+00> : vector<128x128xf32>
    %21 = tpu.matmul %19, %20, %cst_17 {dimension_numbers = #tpu.dot_dimension_numbers<[1], [0], [0], [1], [0, 0, 1, 1], [], []>} : vector<128x128xbf16>, vector<128x128xbf16>, vector<128x128xf32> -> vector<128x128xf32>
    %c0_18 = arith.constant 0 : index
    %c0_19 = arith.constant 0 : index
    %22 = vector.load %arg7[%c0_18, %c0_19] : memref<1x128xf32, #tpu.memory_space<vmem>>, vector<1x128xf32>
    %23 = vector.broadcast %22 : vector<1x128xf32> to vector<128x128xf32>
    %24 = arith.addf %21, %23 : vector<128x128xf32>
    %cst_20 = arith.constant 0.000000e+00 : f32
    %25 = vector.broadcast %cst_20 : f32 to vector<128x128xf32>
    %26 = arith.subf %25, %24 : vector<128x128xf32>
    %27 = math.exp %26 : vector<128x128xf32>
    %cst_21 = arith.constant 1.000000e+00 : f32
    %28 = vector.broadcast %cst_21 : f32 to vector<128x128xf32>
    %29 = arith.addf %28, %27 : vector<128x128xf32>
    %30 = tpu.reciprocal %29 {approx = true} : vector<128x128xf32> -> vector<128x128xf32>
    %c0_22 = arith.constant 0 : index
    %c0_23 = arith.constant 0 : index
    %31 = vector.load %arg8[%c0_22, %c0_23] : memref<128x128xf32, #tpu.memory_space<vmem>>, vector<128x128xf32>
    tpu.vector_store %arg8[%c0_22, %c0_23], %30 {strides = array<i32>} : memref<128x128xf32, #tpu.memory_space<vmem>>, vector<128x128xf32>,
    return
  }
  func.func @transform_0(%arg0: i32) -> (i32, i32) {
    %c0_i32 = arith.constant 0 : i32
    %c0_i32_0 = arith.constant 0 : i32
    %c0_i32_1 = arith.constant 0 : i32
    return %c0_i32, %c0_i32_0 : i32, i32
  }
  func.func @transform_1(%arg0: i32) -> (i32, i32) {
    %c0_i32 = arith.constant 0 : i32
    %c0_i32_0 = arith.constant 0 : i32
    %c0_i32_1 = arith.constant 0 : i32
    return %c0_i32, %c0_i32_0 : i32, i32
  }
  func.func @transform_2(%arg0: i32) -> (i32, i32) {
    %c0_i32 = arith.constant 0 : i32
    %c0_i32_0 = arith.constant 0 : i32
    %c0_i32_1 = arith.constant 0 : i32
    return %c0_i32, %c0_i32_0 : i32, i32
  }
  func.func @transform_3(%arg0: i32) -> (i32, i32) {
    %c0_i32 = arith.constant 0 : i32
    %c0_i32_0 = arith.constant 0 : i32
    %c0_i32_1 = arith.constant 0 : i32
    return %c0_i32, %c0_i32_0 : i32, i32
  }
  func.func @transform_4(%arg0: i32) -> (i32, i32) {
    %c0_i32 = arith.constant 0 : i32
    %c0_i32_0 = arith.constant 0 : i32
    %c0_i32_1 = arith.constant 0 : i32
    return %c0_i32, %c0_i32_0 : i32, i32
  }
  func.func @transform_5(%arg0: i32) -> (i32, i32) {
    %c0_i32 = arith.constant 0 : i32
    %c0_i32_0 = arith.constant 0 : i32
    %c0_i32_1 = arith.constant 0 : i32
    return %c0_i32, %c0_i32_0 : i32, i32
  }
  func.func @transform_6(%arg0: i32) -> (i32, i32) {
    %c0_i32 = arith.constant 0 : i32
    %c0_i32_0 = arith.constant 0 : i32
    %c0_i32_1 = arith.constant 0 : i32
    return %c0_i32, %c0_i32_0 : i32, i32
  }
  func.func @transform_7(%arg0: i32) -> (i32, i32) {
    %c0_i32 = arith.constant 0 : i32
    %c0_i32_0 = arith.constant 0 : i32
    %c0_i32_1 = arith.constant 0 : i32
    return %c0_i32, %c0_i32_0 : i32, i32
  }
}

</mosaic_0001>

<bundles_post_ra>
// kernel: tpu_custom_call.1
= control target key start
LH: loop header
LB: loop body
LE: loop exit
PB: predicated region body
PF: predicated region fallthrough
CT: control target
= control target key end

     0   :  { %12 = vsyncpa [#allocation3], 0  ;;  %s1214_s0 = inlined_call_operand.hbm [shape: bf16[128,128], index: 0, kind: input, shape index: {}]   ;;  %s1215_s1 = inlined_call_operand.hbm [shape: bf16[128,128], index: 1, kind: input, shape index: {}]   ;;  %s1216_s2 = inlined_call_operand.vmem [shape: f32[1,128], index: 2, kind: input, shape index: {}]   ;;  %s1217_s3 = inlined_call_operand.hbm [shape: bf16[128,128], index: 3, kind: input, shape index: {}]   ;;  %s1218_s4 = inlined_call_operand.vmem [shape: f32[1,128], index: 4, kind: input, shape index: {}]   ;;  %s1219_s5 = inlined_call_operand.hbm [shape: bf16[128,128], index: 5, kind: input, shape index: {}]   ;;  %s1220_s6 = inlined_call_operand.vmem [shape: f32[1,128], index: 6, kind: input, shape index: {}]   ;;  %s1221_s7 = inlined_call_operand.hbm [shape: f32[128,128], index: 7, kind: output, shape index: {}]  }
   0x1   :  { %13 = vsyncpa [#allocation6], 0 }
   0x2   :  { %14 = vsyncpa [#allocation9], 0 }
   0x3   :  { %15 = vsyncpa [#allocation4], 0  ;;  %s33_s26 = sshll.u32 %s1215_s1, 4  ;;  %s1091_s27 = smov [#allocation5]   ;;  %s34_s26 = int_to_ptr.hbm [resolvable:$true] %s33_s26 }
   0x4   :  { %s35_s28 = sshll.u32 %s1091_s27, 4  ;;  %s20_s8 = sshll.u32 %s1214_s0, 4  ;;  %s36_s28 = int_to_ptr.vmem [resolvable:$true] %s35_s28  ;;  %s21_s8 = int_to_ptr.hbm [resolvable:$true] %s20_s8 }
   0x5   :  { %s1092_s9 = smov 64   ;;  %s1093_s10 = smov 4  }
   0x6   :  { %41 = dma.hbm_to_vmem [thread:$0]  %s34_s26, 1024, %s36_s28, [#allocation6], %s1092_s9, %s1092_s9, %s1093_s10  }
   0x7   :  { %s1094_s11 = smov [#allocation2]   ;;  %s48_s15 = sshll.u32 %s1217_s3, 4  ;;  %s49_s15 = int_to_ptr.hbm [resolvable:$true] %s48_s15 }
   0x8   :  { %s22_s12 = sshll.u32 %s1094_s11, 4  ;;  %s63_s17 = sshll.u32 %s1219_s5, 4  ;;  %s23_s12 = int_to_ptr.vmem [resolvable:$true] %s22_s12  ;;  %s64_s17 = int_to_ptr.hbm [resolvable:$true] %s63_s17 }
   0x9   :  { %28 = dma.hbm_to_vmem [thread:$0]  %s21_s8, 1024, %s23_s12, [#allocation3], %s1092_s9, %s1092_s9, %s1093_s10  }
   0xa   :  { %s1095_s18 = smov [#allocation7]   ;;  %s1096_s0 = smov [#allocation8]  }
   0xb   :  { %s50_s19 = sshll.u32 %s1095_s18, 4  ;;  %s65_s20 = sshll.u32 %s1096_s0, 4  ;;  %s51_s19 = int_to_ptr.vmem [resolvable:$true] %s50_s19  ;;  %s66_s20 = int_to_ptr.vmem [resolvable:$true] %s65_s20 }
   0xc   :  { %56 = dma.hbm_to_vmem [thread:$0]  %s49_s15, 1024, %s51_s19, [#allocation6], %s1092_s9, %s1092_s9, %s1093_s10  }
   0xd   :  { %71 = dma.hbm_to_vmem [thread:$0]  %s64_s17, 1024, %s66_s20, [#allocation9], %s1092_s9, %s1092_s9, %s1093_s10  }
   0xe   :  { %1083 = dma.done.wait [#allocation3], 1024  }
   0xf   :  { %1084 = vsyncadd [#allocation3], 4294966272 }
  0x10   :  { %1085 = dma.done.wait [#allocation6], 2048  }
  0x11   :  { %1086 = vsyncadd [#allocation6], 4294965248 }
  0x12   :  { %1087 = dma.done.wait [#allocation9], 1024  }
  0x13   :  { %1088 = vsyncadd [#allocation9], 4294966272  ;;  %v870_v0 = vld [vmem:[#allocation5 + $0x38] sm:$0xff]  ;;  %v869_v1 = vld [vmem:[#allocation5 + $0x30] sm:$0xff]  ;;  %s712_s26 = sshll.u32 %s1221_s7, 4  ;;  %s1098_s27 = smov 128   ;;  %s713_s26 = int_to_ptr.hbm [resolvable:$true] %s712_s26 }
  0x14   :  { %222 = vmatpush.bf16.msra.mxu0 %v870_v0  ;;  %v868_v2 = vld [vmem:[#allocation5 + $0x28] sm:$0xff]  ;;  %v867_v3 = vld [vmem:[#allocation5 + $0x20] sm:$0xff]  ;;  %v866_v4 = vld [vmem:[#allocation5 + $0x18] sm:$0xff]  ;;  %s1099_s28 = smov 8  }
  0x15   :  { %v865_v5 = vld [vmem:[#allocation5 + $0x10] sm:$0xff]  ;;  %v864_v6 = vld [vmem:[#allocation5 + $0x8] sm:$0xff]  ;;  %v863_v7 = vld [vmem:[#allocation5] sm:$0xff] }
  0x16   :  { %v1152_v8 = vld [vmem:[#allocation2] sm:$0xff]  ;;  %v1155_v9 = vld [vmem:[#allocation2 + $0x8] sm:$0xff]  ;;  %v1158_v10 = vld [vmem:[#allocation2 + $0x10] sm:$0xff] }
  0x17   :  { %v1161_v11 = vld [vmem:[#allocation2 + $0x18] sm:$0xff]  ;;  %v1164_v12 = vld [vmem:[#allocation2 + $0x20] sm:$0xff]  ;;  %v1167_v14 = vld [vmem:[#allocation2 + $0x28] sm:$0xff] }
  0x18   :  { %223 = vmatpush.bf16.msra.mxu0 %v869_v1  ;;  %v878_v13 = vld [vmem:[#allocation7 + $0x38] sm:$0xff]  ;;  %v877_v15 = vld [vmem:[#allocation7 + $0x30] sm:$0xff]  ;;  %v876_v16 = vld [vmem:[#allocation7 + $0x28] sm:$0xff] }
  0x19   :  { %359 = vmatpush.bf16.msra.mxu1 %v878_v13  ;;  %v875_v17 = vld [vmem:[#allocation7 + $0x20] sm:$0xff]  ;;  %v874_v18 = vld [vmem:[#allocation7 + $0x18] sm:$0xff]  ;;  %v1170_v19 = vld [vmem:[#allocation2 + $0x30] sm:$0xff] }
  0x1a   :  { %v873_v20 = vld [vmem:[#allocation7 + $0x10] sm:$0xff]  ;;  %v872_v21 = vld [vmem:[#allocation7 + $0x8] sm:$0xff]  ;;  %v871_v22 = vld [vmem:[#allocation7] sm:$0xff] }
  0x1b   :  { %v1173_v23 = vld [vmem:[#allocation2 + $0x38] sm:$0xff]  ;;  %v896_v25 = vld [vmem:[%s1216_s2] ss:$0 sm:$0xff] }
  0x1c   :  { %224 = vmatpush.bf16.msra.mxu0 %v868_v2 }
  0x1d   :  { %360 = vmatpush.bf16.msra.mxu1 %v877_v15 }
  0x20   :  { %225 = vmatpush.bf16.msra.mxu0 %v867_v3 }
  0x21   :  { %361 = vmatpush.bf16.msra.mxu1 %v876_v16 }
  0x24   :  { %226 = vmatpush.bf16.msra.mxu0 %v866_v4 }
  0x25   :  { %362 = vmatpush.bf16.msra.mxu1 %v875_v17 }
  0x28   :  { %227 = vmatpush.bf16.msra.mxu0 %v865_v5 }
  0x29   :  { %363 = vmatpush.bf16.msra.mxu1 %v874_v18 }
  0x2c   :  { %228 = vmatpush.bf16.msra.mxu0 %v864_v6 }
  0x2d   :  { %364 = vmatpush.bf16.msra.mxu1 %v873_v20 }
  0x30   :  { %229 = vmatpush.bf16.msra.mxu0 %v863_v7 }
  0x31   :  { %365 = vmatpush.bf16.msra.mxu1 %v872_v21 }
  0x33   :  { %230 = vmatmul.bf16.vlgmr.msra.gmra.mxu0 %v1152_v8 }
  0x35   :  { %366 = vmatpush.bf16.msra.mxu1 %v871_v22 }
  0x43   :  { %235 = vmatmul.bf16.gmra.mxu0 %v1155_v9 }
  0x53   :  { %240 = vmatmul.bf16.gmra.mxu0 %v1158_v10 }
  0x63   :  { %245 = vmatmul.bf16.gmra.mxu0 %v1161_v11 }
  0x73   :  { %250 = vmatmul.bf16.gmra.mxu0 %v1164_v12 }
  0x83   :  { %255 = vmatmul.bf16.gmra.mxu0 %v1167_v14 }
  0x93   :  { %260 = vmatmul.bf16.gmra.mxu0 %v1170_v19 }
  0xa3   :  { %265 = vmatmul.bf16.gmra.mxu0 %v1173_v23 }
  0xb0   :  { %v231_v24 = vpop.f32.mrf.mxu0 }
  0xb1   :  { %v232_v26 = vadd.f32 %v896_v25, %v231_v24 }
  0xb3   :  { %v271_v29 = vmax.f32 %v232_v26, 0.0 }
  0xb8   :  { %v233_v27 = vpop.f32.mrf.mxu0 }
  0xb9   :  { %v234_v28 = vadd.f32 %v896_v25, %v233_v27 }
  0xbb   :  { %v272_v30 = vmax.f32 %v234_v28, 0.0 }
  0xbd   :  { %v287_v31 = vpack.c.bf16 %v272_v30, %v271_v29 }
  0xbf   :  { %367 = vmatmul.bf16.vlgmr.msra.gmra.mxu1 %v287_v31 }
  0xc0   :  { %v236_v32 = vpop.f32.mrf.mxu0 }
  0xc1   :  { %v237_v33 = vadd.f32 %v896_v25, %v236_v32 }
  0xc3   :  { %v273_v36 = vmax.f32 %v237_v33, 0.0 }
  0xc8   :  { %v238_v34 = vpop.f32.mrf.mxu0 }
  0xc9   :  { %v239_v35 = vadd.f32 %v896_v25, %v238_v34 }
  0xcb   :  { %v274_v37 = vmax.f32 %v239_v35, 0.0 }
  0xcd   :  { %v288_v38 = vpack.c.bf16 %v274_v37, %v273_v36 }
  0xcf   :  { %372 = vmatmul.bf16.gmra.mxu1 %v288_v38 }
  0xd0   :  { %v241_v39 = vpop.f32.mrf.mxu0 }
  0xd1   :  { %v242_v40 = vadd.f32 %v896_v25, %v241_v39 }
  0xd3   :  { %v275_v43 = vmax.f32 %v242_v40, 0.0 }
  0xd8   :  { %v243_v41 = vpop.f32.mrf.mxu0 }
  0xd9   :  { %v244_v42 = vadd.f32 %v896_v25, %v243_v41 }
  0xdb   :  { %v276_v44 = vmax.f32 %v244_v42, 0.0 }
  0xdd   :  { %v289_v45 = vpack.c.bf16 %v276_v44, %v275_v43 }
  0xdf   :  { %377 = vmatmul.bf16.gmra.mxu1 %v289_v45 }
  0xe0   :  { %v246_v46 = vpop.f32.mrf.mxu0 }
  0xe1   :  { %v247_v47 = vadd.f32 %v896_v25, %v246_v46 }
  0xe3   :  { %v277_v50 = vmax.f32 %v247_v47, 0.0 }
  0xe8   :  { %v248_v48 = vpop.f32.mrf.mxu0 }
  0xe9   :  { %v249_v49 = vadd.f32 %v896_v25, %v248_v48 }
  0xeb   :  { %v278_v51 = vmax.f32 %v249_v49, 0.0  ;;  %v886_v49 = vld [vmem:[#allocation8 + $0x38] sm:$0xff] }
  0xec   :  { %561 = vmatpush.bf16.msra.mxu3 %v886_v49 }
  0xed   :  { %v290_v52 = vpack.c.bf16 %v278_v51, %v277_v50  ;;  %v885_v50 = vld [vmem:[#allocation8 + $0x30] sm:$0xff]  ;;  %v884_v51 = vld [vmem:[#allocation8 + $0x28] sm:$0xff] }
  0xef   :  { %382 = vmatmul.bf16.gmra.mxu1 %v290_v52  ;;  %v883_v52 = vld [vmem:[#allocation8 + $0x20] sm:$0xff] }
  0xf0   :  { %v251_v53 = vpop.f32.mrf.mxu0  ;;  %562 = vmatpush.bf16.msra.mxu3 %v885_v50  ;;  %v1193_v50 = vld [vmem:[%s1220_s6] ss:$0 sm:$0xff]  ;;  %s1097_s6 = smov [#allocation10]  }
  0xf1   :  { %v252_v54 = vadd.f32 %v896_v25, %v251_v53  ;;  %s710_s23 = sshll.u32 %s1097_s6, 4  ;;  %s711_s23 = int_to_ptr.vmem [resolvable:$true] %s710_s23 }
  0xf3   :  { %v279_v57 = vmax.f32 %v252_v54, 0.0 }
  0xf4   :  { %563 = vmatpush.bf16.msra.mxu3 %v884_v51 }
  0xf8   :  { %v253_v55 = vpop.f32.mrf.mxu0  ;;  %564 = vmatpush.bf16.msra.mxu3 %v883_v52 }
  0xf9   :  { %v254_v56 = vadd.f32 %v896_v25, %v253_v55 }
  0xfb   :  { %v280_v58 = vmax.f32 %v254_v56, 0.0 }
  0xfd   :  { %v291_v59 = vpack.c.bf16 %v280_v58, %v279_v57 }
  0xff   :  { %387 = vmatmul.bf16.gmra.mxu1 %v291_v59 }
 0x100   :  { %v256_v60 = vpop.f32.mrf.mxu0 }
 0x101   :  { %v257_v61 = vadd.f32 %v896_v25, %v256_v60 }
 0x103   :  { %v281_v0 = vmax.f32 %v257_v61, 0.0 }
 0x108   :  { %v258_v62 = vpop.f32.mrf.mxu0 }
 0x109   :  { %v259_v63 = vadd.f32 %v896_v25, %v258_v62 }
 0x10b   :  { %v282_v1 = vmax.f32 %v259_v63, 0.0 }
 0x10d   :  { %v292_v2 = vpack.c.bf16 %v282_v1, %v281_v0 }
 0x10f   :  { %392 = vmatmul.bf16.gmra.mxu1 %v292_v2 }
 0x110   :  { %v261_v3 = vpop.f32.mrf.mxu0 }
 0x111   :  { %v262_v4 = vadd.f32 %v896_v25, %v261_v3 }
 0x113   :  { %v283_v7 = vmax.f32 %v262_v4, 0.0 }
 0x118   :  { %v263_v5 = vpop.f32.mrf.mxu0 }
 0x119   :  { %v264_v6 = vadd.f32 %v896_v25, %v263_v5 }
 0x11b   :  { %v284_v13 = vmax.f32 %v264_v6, 0.0 }
 0x11d   :  { %v293_v15 = vpack.c.bf16 %v284_v13, %v283_v7 }
 0x11f   :  { %397 = vmatmul.bf16.gmra.mxu1 %v293_v15 }
 0x120   :  { %v266_v16 = vpop.f32.mrf.mxu0 }
 0x121   :  { %v267_v17 = vadd.f32 %v896_v25, %v266_v16 }
 0x123   :  { %v285_v21 = vmax.f32 %v267_v17, 0.0 }
 0x128   :  { %v268_v18 = vpop.f32.mrf.mxu0 }
 0x129   :  { %v269_v20 = vadd.f32 %v896_v25, %v268_v18 }
 0x12b   :  { %v286_v22 = vmax.f32 %v269_v20, 0.0 }
 0x12d   :  { %v294_v24 = vpack.c.bf16 %v286_v22, %v285_v21 }
 0x12f   :  { %402 = vmatmul.bf16.gmra.mxu1 %v294_v24 }
 0x13c   :  { %v368_v26 = vpop.f32.mrf.mxu1 }
 0x144   :  { %v370_v27 = vpop.f32.mrf.mxu1 }
 0x145   :  { %v408_v28 = vpack.c.bf16 %v370_v27, %v368_v26 }
 0x14c   :  { %v373_v29 = vpop.f32.mrf.mxu1 }
 0x154   :  { %v375_v30 = vpop.f32.mrf.mxu1 }
 0x155   :  { %v409_v31 = vpack.c.bf16 %v375_v30, %v373_v29 }
 0x15c   :  { %v378_v32 = vpop.f32.mrf.mxu1 }
 0x164   :  { %v380_v33 = vpop.f32.mrf.mxu1 }
 0x165   :  { %v410_v34 = vpack.c.bf16 %v380_v33, %v378_v32 }
 0x16c   :  { %v383_v35 = vpop.f32.mrf.mxu1 }
 0x174   :  { %v385_v36 = vpop.f32.mrf.mxu1 }
 0x175   :  { %v411_v37 = vpack.c.bf16 %v385_v36, %v383_v35 }
 0x17c   :  { %v388_v38 = vpop.f32.mrf.mxu1 }
 0x184   :  { %v390_v39 = vpop.f32.mrf.mxu1 }
 0x185   :  { %v412_v48 = vpack.c.bf16 %v390_v39, %v388_v38 }
 0x18c   :  { %v393_v40 = vpop.f32.mrf.mxu1 }
 0x194   :  { %v395_v25 = vpop.f32.mrf.mxu1 }
 0x195   :  { %v413_v47 = vpack.c.bf16 %v395_v25, %v393_v40 }
 0x19c   :  { %v398_v41 = vpop.f32.mrf.mxu1 }
 0x1a4   :  { %v400_v42 = vpop.f32.mrf.mxu1 }
 0x1a5   :  { %v414_v46 = vpack.c.bf16 %v400_v42, %v398_v41 }
 0x1ac   :  { %v403_v43 = vpop.f32.mrf.mxu1 }
 0x1b4   :  { %v405_v44 = vpop.f32.mrf.mxu1 }
 0x1b5   :  { %v415_v45 = vpack.c.bf16 %v405_v44, %v403_v43 }
 0x1b7   :  { %420 = vmatpush.bf16.msra.mxu2 %v415_v45 }
 0x1bb   :  { %421 = vmatpush.bf16.msra.mxu2 %v414_v46 }
 0x1bf   :  { %422 = vmatpush.bf16.msra.mxu2 %v413_v47 }
 0x1c3   :  { %423 = vmatpush.bf16.msra.mxu2 %v412_v48 }
 0x1c7   :  { %424 = vmatpush.bf16.msra.mxu2 %v411_v37 }
 0x1cb   :  { %425 = vmatpush.bf16.msra.mxu2 %v410_v34 }
 0x1cf   :  { %426 = vmatpush.bf16.msra.mxu2 %v409_v31 }
 0x1d3   :  { %427 = vmatpush.bf16.msra.mxu2 %v408_v28 }
 0x1d6   :  { %428 = vmatmul.bf16.vlgmr.msra.gmra.mxu2 %v1152_v8  ;;  %v882_v8 = vld [vmem:[#allocation8 + $0x18] sm:$0xff] }
 0x1d7   :  { %565 = vmatpush.bf16.msra.mxu3 %v882_v8 }
 0x1e6   :  { %433 = vmatmul.bf16.gmra.mxu2 %v1155_v9  ;;  %v881_v9 = vld [vmem:[#allocation8 + $0x10] sm:$0xff] }
 0x1e7   :  { %566 = vmatpush.bf16.msra.mxu3 %v881_v9 }
 0x1f6   :  { %438 = vmatmul.bf16.gmra.mxu2 %v1158_v10  ;;  %v880_v10 = vld [vmem:[#allocation8 + $0x8] sm:$0xff] }
 0x1f7   :  { %567 = vmatpush.bf16.msra.mxu3 %v880_v10 }
 0x206   :  { %443 = vmatmul.bf16.gmra.mxu2 %v1161_v11  ;;  %v879_v11 = vld [vmem:[#allocation8] sm:$0xff] }
 0x207   :  { %568 = vmatpush.bf16.msra.mxu3 %v879_v11 }
 0x216   :  { %448 = vmatmul.bf16.gmra.mxu2 %v1164_v12 }
 0x226   :  { %453 = vmatmul.bf16.gmra.mxu2 %v1167_v14  ;;  %v897_v14 = vld [vmem:[%s1218_s4] ss:$0 sm:$0xff] }
 0x236   :  { %458 = vmatmul.bf16.gmra.mxu2 %v1170_v19 }
 0x246   :  { %463 = vmatmul.bf16.gmra.mxu2 %v1173_v23 }
 0x259   :  { %v429_v12 = vpop.f32.mrf.mxu2 }
 0x25a   :  { %v430_v53 = vadd.f32 %v897_v14, %v429_v12 }
 0x25c   :  { %v469_v56 = vmax.f32 %v430_v53, 0.0 }
 0x261   :  { %v431_v54 = vpop.f32.mrf.mxu2 }
 0x262   :  { %v432_v55 = vadd.f32 %v897_v14, %v431_v54 }
 0x264   :  { %v470_v19 = vmax.f32 %v432_v55, 0.0 }
 0x266   :  { %v485_v57 = vpack.c.bf16 %v470_v19, %v469_v56 }
 0x268   :  { %569 = vmatmul.bf16.vlgmr.msra.gmra.mxu3 %v485_v57 }
 0x269   :  { %v434_v58 = vpop.f32.mrf.mxu2 }
 0x26a   :  { %v435_v59 = vadd.f32 %v897_v14, %v434_v58 }
 0x26c   :  { %v471_v62 = vmax.f32 %v435_v59, 0.0 }
 0x271   :  { %v436_v60 = vpop.f32.mrf.mxu2 }
 0x272   :  { %v437_v61 = vadd.f32 %v897_v14, %v436_v60 }
 0x274   :  { %v472_v63 = vmax.f32 %v437_v61, 0.0 }
 0x276   :  { %v486_v0 = vpack.c.bf16 %v472_v63, %v471_v62 }
 0x278   :  { %574 = vmatmul.bf16.gmra.mxu3 %v486_v0 }
 0x279   :  { %v439_v23 = vpop.f32.mrf.mxu2 }
 0x27a   :  { %v440_v1 = vadd.f32 %v897_v14, %v439_v23 }
 0x27c   :  { %v473_v4 = vmax.f32 %v440_v1, 0.0 }
 0x281   :  { %v441_v2 = vpop.f32.mrf.mxu2 }
 0x282   :  { %v442_v3 = vadd.f32 %v897_v14, %v441_v2 }
 0x284   :  { %v474_v5 = vmax.f32 %v442_v3, 0.0 }
 0x286   :  { %v487_v6 = vpack.c.bf16 %v474_v5, %v473_v4 }
 0x288   :  { %579 = vmatmul.bf16.gmra.mxu3 %v487_v6 }
 0x289   :  { %v444_v7 = vpop.f32.mrf.mxu2 }
 0x28a   :  { %v445_v13 = vadd.f32 %v897_v14, %v444_v7 }
 0x28c   :  { %v475_v17 = vmax.f32 %v445_v13, 0.0 }
 0x291   :  { %v446_v15 = vpop.f32.mrf.mxu2 }
 0x292   :  { %v447_v16 = vadd.f32 %v897_v14, %v446_v15 }
 0x294   :  { %v476_v18 = vmax.f32 %v447_v16, 0.0 }
 0x296   :  { %v488_v20 = vpack.c.bf16 %v476_v18, %v475_v17 }
 0x298   :  { %584 = vmatmul.bf16.gmra.mxu3 %v488_v20 }
 0x299   :  { %v449_v21 = vpop.f32.mrf.mxu2 }
 0x29a   :  { %v450_v22 = vadd.f32 %v897_v14, %v449_v21 }
 0x29c   :  { %v477_v27 = vmax.f32 %v450_v22, 0.0 }
 0x2a1   :  { %v451_v24 = vpop.f32.mrf.mxu2 }
 0x2a2   :  { %v452_v26 = vadd.f32 %v897_v14, %v451_v24 }
 0x2a4   :  { %v478_v28 = vmax.f32 %v452_v26, 0.0 }
 0x2a6   :  { %v489_v29 = vpack.c.bf16 %v478_v28, %v477_v27 }
 0x2a8   :  { %589 = vmatmul.bf16.gmra.mxu3 %v489_v29 }
 0x2a9   :  { %v454_v30 = vpop.f32.mrf.mxu2 }
 0x2aa   :  { %v455_v31 = vadd.f32 %v897_v14, %v454_v30 }
 0x2ac   :  { %v479_v34 = vmax.f32 %v455_v31, 0.0 }
 0x2b1   :  { %v456_v32 = vpop.f32.mrf.mxu2 }
 0x2b2   :  { %v457_v33 = vadd.f32 %v897_v14, %v456_v32 }
 0x2b4   :  { %v480_v35 = vmax.f32 %v457_v33, 0.0 }
 0x2b6   :  { %v490_v36 = vpack.c.bf16 %v480_v35, %v479_v34 }
 0x2b8   :  { %594 = vmatmul.bf16.gmra.mxu3 %v490_v36 }
 0x2b9   :  { %v459_v37 = vpop.f32.mrf.mxu2 }
 0x2ba   :  { %v460_v38 = vadd.f32 %v897_v14, %v459_v37 }
 0x2bc   :  { %v481_v25 = vmax.f32 %v460_v38, 0.0 }
 0x2c1   :  { %v461_v39 = vpop.f32.mrf.mxu2 }
 0x2c2   :  { %v462_v40 = vadd.f32 %v897_v14, %v461_v39 }
 0x2c4   :  { %v482_v41 = vmax.f32 %v462_v40, 0.0 }
 0x2c6   :  { %v491_v42 = vpack.c.bf16 %v482_v41, %v481_v25 }
 0x2c8   :  { %599 = vmatmul.bf16.gmra.mxu3 %v491_v42 }
 0x2c9   :  { %v464_v43 = vpop.f32.mrf.mxu2 }
 0x2ca   :  { %v465_v44 = vadd.f32 %v897_v14, %v464_v43 }
 0x2cc   :  { %v483_v47 = vmax.f32 %v465_v44, 0.0 }
 0x2d1   :  { %v466_v45 = vpop.f32.mrf.mxu2 }
 0x2d2   :  { %v467_v46 = vadd.f32 %v897_v14, %v466_v45 }
 0x2d4   :  { %v484_v48 = vmax.f32 %v467_v46, 0.0 }
 0x2d6   :  { %v492_v49 = vpack.c.bf16 %v484_v48, %v483_v47 }
 0x2d8   :  { %604 = vmatmul.bf16.gmra.mxu3 %v492_v49 }
 0x2eb   :  { %v570_v51 = vpop.f32.mrf.mxu3 }
 0x2ec   :  { %v571_v52 = vadd.f32 %v1193_v50, %v570_v51 }
 0x2ee   :  { %v610_v8 = vsub.f32 0.0, %v571_v52 }
 0x2f0   :  { %v626_v9 = vmul.f32 1.442695, %v610_v8 }
 0x2f2   :  { %899 = vpow2.f32 %v626_v9 }
 0x2f3   :  { %v572_v10 = vpop.f32.mrf.mxu3 }
 0x2f4   :  { %v573_v11 = vadd.f32 %v1193_v50, %v572_v10 }
 0x2f6   :  { %v611_v12 = vsub.f32 0.0, %v573_v11 }
 0x2f8   :  { %v900_v14 = vpop.eup %899  ;;  %v628_v53 = vmul.f32 1.442695, %v611_v12 }
 0x2f9   :  { %v658_v54 = vadd.f32 1.0, %v900_v14 }
 0x2fa   :  { %901 = vpow2.f32 %v628_v53 }
 0x2fb   :  { %903 = vrcp.f32 %v658_v54  ;;  %v575_v55 = vpop.f32.mrf.mxu3 }
 0x2fc   :  { %v576_v56 = vadd.f32 %v1193_v50, %v575_v55 }
 0x2fe   :  { %v612_v19 = vsub.f32 0.0, %v576_v56 }
 0x300   :  { %v902_v57 = vpop.eup %901  ;;  %v630_v58 = vmul.f32 1.442695, %v612_v19 }
 0x301   :  { %v904_v59 = vpop.eup %903  ;;  %v659_v60 = vadd.f32 1.0, %v902_v57 }
 0x302   :  { %690 = vst [vmem:[#allocation10] sm:$0xff] %v904_v59  ;;  %905 = vpow2.f32 %v630_v58 }
 0x303   :  { %907 = vrcp.f32 %v659_v60  ;;  %v577_v61 = vpop.f32.mrf.mxu3 }
 0x304   :  { %v578_v62 = vadd.f32 %v1193_v50, %v577_v61 }
 0x306   :  { %v613_v63 = vsub.f32 0.0, %v578_v62 }
 0x308   :  { %v906_v0 = vpop.eup %905  ;;  %v632_v23 = vmul.f32 1.442695, %v613_v63 }
 0x309   :  { %v908_v1 = vpop.eup %907  ;;  %v660_v2 = vadd.f32 1.0, %v906_v0 }
 0x30a   :  { %691 = vst [vmem:[#allocation10 + $0x8] sm:$0xff] %v908_v1  ;;  %909 = vpow2.f32 %v632_v23 }
 0x30b   :  { %911 = vrcp.f32 %v660_v2  ;;  %v580_v3 = vpop.f32.mrf.mxu3 }
 0x30c   :  { %v581_v4 = vadd.f32 %v1193_v50, %v580_v3 }
 0x30e   :  { %v614_v5 = vsub.f32 0.0, %v581_v4 }
 0x310   :  { %v910_v6 = vpop.eup %909  ;;  %v634_v7 = vmul.f32 1.442695, %v614_v5 }
 0x311   :  { %v912_v13 = vpop.eup %911  ;;  %v661_v15 = vadd.f32 1.0, %v910_v6 }
 0x312   :  { %692 = vst [vmem:[#allocation10 + $0x10] sm:$0xff] %v912_v13  ;;  %913 = vpow2.f32 %v634_v7 }
 0x313   :  { %915 = vrcp.f32 %v661_v15  ;;  %v582_v16 = vpop.f32.mrf.mxu3 }
 0x314   :  { %v583_v17 = vadd.f32 %v1193_v50, %v582_v16 }
 0x316   :  { %v615_v18 = vsub.f32 0.0, %v583_v17 }
 0x318   :  { %v914_v20 = vpop.eup %913  ;;  %v636_v21 = vmul.f32 1.442695, %v615_v18 }
 0x319   :  { %v916_v22 = vpop.eup %915  ;;  %v662_v24 = vadd.f32 1.0, %v914_v20 }
 0x31a   :  { %693 = vst [vmem:[#allocation10 + $0x18] sm:$0xff] %v916_v22  ;;  %917 = vpow2.f32 %v636_v21 }
 0x31b   :  { %919 = vrcp.f32 %v662_v24  ;;  %v585_v26 = vpop.f32.mrf.mxu3 }
 0x31c   :  { %v586_v27 = vadd.f32 %v1193_v50, %v585_v26 }
 0x31e   :  { %v616_v28 = vsub.f32 0.0, %v586_v27 }
 0x320   :  { %v918_v29 = vpop.eup %917  ;;  %v638_v30 = vmul.f32 1.442695, %v616_v28 }
 0x321   :  { %v920_v31 = vpop.eup %919  ;;  %v663_v32 = vadd.f32 1.0, %v918_v29 }
 0x322   :  { %694 = vst [vmem:[#allocation10 + $0x20] sm:$0xff] %v920_v31  ;;  %921 = vpow2.f32 %v638_v30 }
 0x323   :  { %923 = vrcp.f32 %v663_v32  ;;  %v587_v33 = vpop.f32.mrf.mxu3 }
 0x324   :  { %v588_v34 = vadd.f32 %v1193_v50, %v587_v33 }
 0x326   :  { %v617_v35 = vsub.f32 0.0, %v588_v34 }
 0x328   :  { %v922_v36 = vpop.eup %921  ;;  %v640_v37 = vmul.f32 1.442695, %v617_v35 }
 0x329   :  { %v924_v38 = vpop.eup %923  ;;  %v664_v39 = vadd.f32 1.0, %v922_v36 }
 0x32a   :  { %695 = vst [vmem:[#allocation10 + $0x28] sm:$0xff] %v924_v38  ;;  %925 = vpow2.f32 %v640_v37 }
 0x32b   :  { %927 = vrcp.f32 %v664_v39  ;;  %v590_v40 = vpop.f32.mrf.mxu3 }
 0x32c   :  { %v591_v25 = vadd.f32 %v1193_v50, %v590_v40 }
 0x32e   :  { %v618_v41 = vsub.f32 0.0, %v591_v25 }
 0x330   :  { %v926_v42 = vpop.eup %925  ;;  %v642_v43 = vmul.f32 1.442695, %v618_v41 }
 0x331   :  { %v928_v44 = vpop.eup %927  ;;  %v665_v45 = vadd.f32 1.0, %v926_v42 }
 0x332   :  { %696 = vst [vmem:[#allocation10 + $0x30] sm:$0xff] %v928_v44  ;;  %929 = vpow2.f32 %v642_v43 }
 0x333   :  { %931 = vrcp.f32 %v665_v45  ;;  %v592_v46 = vpop.f32.mrf.mxu3 }
 0x334   :  { %v593_v47 = vadd.f32 %v1193_v50, %v592_v46 }
 0x336   :  { %v619_v48 = vsub.f32 0.0, %v593_v47 }
 0x338   :  { %v930_v49 = vpop.eup %929  ;;  %v644_v51 = vmul.f32 1.442695, %v619_v48 }
 0x339   :  { %v932_v52 = vpop.eup %931  ;;  %v666_v8 = vadd.f32 1.0, %v930_v49 }
 0x33a   :  { %697 = vst [vmem:[#allocation10 + $0x38] sm:$0xff] %v932_v52  ;;  %933 = vpow2.f32 %v644_v51 }
 0x33b   :  { %935 = vrcp.f32 %v666_v8  ;;  %v595_v9 = vpop.f32.mrf.mxu3 }
 0x33c   :  { %v596_v10 = vadd.f32 %v1193_v50, %v595_v9 }
 0x33e   :  { %v620_v11 = vsub.f32 0.0, %v596_v10 }
 0x340   :  { %v934_v12 = vpop.eup %933  ;;  %v646_v14 = vmul.f32 1.442695, %v620_v11 }
 0x341   :  { %v936_v53 = vpop.eup %935  ;;  %v667_v54 = vadd.f32 1.0, %v934_v12 }
 0x342   :  { %698 = vst [vmem:[#allocation10 + $0x40] sm:$0xff] %v936_v53  ;;  %937 = vpow2.f32 %v646_v14 }
 0x343   :  { %939 = vrcp.f32 %v667_v54  ;;  %v597_v55 = vpop.f32.mrf.mxu3 }
 0x344   :  { %v598_v56 = vadd.f32 %v1193_v50, %v597_v55 }
 0x346   :  { %v621_v19 = vsub.f32 0.0, %v598_v56 }
 0x348   :  { %v938_v57 = vpop.eup %937  ;;  %v648_v58 = vmul.f32 1.442695, %v621_v19 }
 0x349   :  { %v940_v59 = vpop.eup %939  ;;  %v668_v60 = vadd.f32 1.0, %v938_v57 }
 0x34a   :  { %699 = vst [vmem:[#allocation10 + $0x48] sm:$0xff] %v940_v59  ;;  %941 = vpow2.f32 %v648_v58 }
 0x34b   :  { %943 = vrcp.f32 %v668_v60  ;;  %v600_v61 = vpop.f32.mrf.mxu3 }
 0x34c   :  { %v601_v62 = vadd.f32 %v1193_v50, %v600_v61 }
 0x34e   :  { %v622_v63 = vsub.f32 0.0, %v601_v62 }
 0x350   :  { %v942_v0 = vpop.eup %941  ;;  %v650_v23 = vmul.f32 1.442695, %v622_v63 }
 0x351   :  { %v944_v1 = vpop.eup %943  ;;  %v669_v2 = vadd.f32 1.0, %v942_v0 }
 0x352   :  { %700 = vst [vmem:[#allocation10 + $0x50] sm:$0xff] %v944_v1  ;;  %945 = vpow2.f32 %v650_v23 }
 0x353   :  { %947 = vrcp.f32 %v669_v2  ;;  %v602_v3 = vpop.f32.mrf.mxu3 }
 0x354   :  { %v603_v4 = vadd.f32 %v1193_v50, %v602_v3 }
 0x356   :  { %v623_v5 = vsub.f32 0.0, %v603_v4 }
 0x358   :  { %v946_v6 = vpop.eup %945  ;;  %v652_v7 = vmul.f32 1.442695, %v623_v5 }
 0x359   :  { %v948_v13 = vpop.eup %947  ;;  %v670_v15 = vadd.f32 1.0, %v946_v6 }
 0x35a   :  { %701 = vst [vmem:[#allocation10 + $0x58] sm:$0xff] %v948_v13  ;;  %949 = vpow2.f32 %v652_v7 }
 0x35b   :  { %951 = vrcp.f32 %v670_v15  ;;  %v605_v16 = vpop.f32.mrf.mxu3 }
 0x35c   :  { %v606_v17 = vadd.f32 %v1193_v50, %v605_v16 }
 0x35e   :  { %v624_v18 = vsub.f32 0.0, %v606_v17 }
 0x360   :  { %v950_v20 = vpop.eup %949  ;;  %v654_v21 = vmul.f32 1.442695, %v624_v18 }
 0x361   :  { %v952_v22 = vpop.eup %951  ;;  %v671_v24 = vadd.f32 1.0, %v950_v20 }
 0x362   :  { %702 = vst [vmem:[#allocation10 + $0x60] sm:$0xff] %v952_v22  ;;  %953 = vpow2.f32 %v654_v21 }
 0x363   :  { %955 = vrcp.f32 %v671_v24  ;;  %v607_v26 = vpop.f32.mrf.mxu3 }
 0x364   :  { %v608_v27 = vadd.f32 %v1193_v50, %v607_v26 }
 0x366   :  { %v625_v28 = vsub.f32 0.0, %v608_v27 }
 0x368   :  { %v954_v29 = vpop.eup %953  ;;  %v656_v30 = vmul.f32 1.442695, %v625_v28 }
 0x369   :  { %v956_v31 = vpop.eup %955  ;;  %v672_v32 = vadd.f32 1.0, %v954_v29 }
 0x36a   :  { %703 = vst [vmem:[#allocation10 + $0x68] sm:$0xff] %v956_v31  ;;  %957 = vpow2.f32 %v656_v30 }
 0x36b   :  { %959 = vrcp.f32 %v672_v32 }
 0x370   :  { %v958_v33 = vpop.eup %957 }
 0x371   :  { %v960_v34 = vpop.eup %959  ;;  %v673_v35 = vadd.f32 1.0, %v958_v33 }
 0x372   :  { %704 = vst [vmem:[#allocation10 + $0x70] sm:$0xff] %v960_v34 }
 0x373   :  { %961 = vrcp.f32 %v673_v35 }
 0x379   :  { %v962_v50 = vpop.eup %961 }
 0x37a   :  { %705 = vst [vmem:[#allocation10 + $0x78] sm:$0xff] %v962_v50 }
 0x37b   :  { %718 = dma.vmem_to_hbm [thread:$0]  %s711_s23, 2048, %s713_s26, [#allocation4], %s1098_s27, %s1098_s27, %s1099_s28  }
 0x37c   :  { %1089 = dma.done.wait [#allocation4], 2048  }
 0x37d   :  { %1090 = vsyncadd [#allocation4], 4294965248 }
 0x37e   :  { %723 = vsyncpa [#allocation3], 1 }
 0x37f   :  { %724 = vsyncpa [#allocation6], 1 }
 0x380   :  { %725 = vsyncpa [#allocation9], 1 }
 0x381   :  { %726 = vsyncpa [#allocation4], 1 }

</bundles_post_ra>
